<compile_context>
chip_gen: v5e
topology: v5e:2x2
jax: 0.10.0
libtpu: 0.0.40
codegen_flags: <defaults>
</compile_context>

<pallas_src>
import functools

import jax
import jax.numpy as jnp
from jax.experimental import pallas as pl
from jax.experimental.pallas import tpu as pltpu


def _dist_partial_kernel(x_ref, labels_ref, centers_ref, partial_ref, *,
                         num_classes, batch, block_rows, needs_mask,
                         use_mxu_gather):
    """Per-tile: sum_r ||x[r] - centers[labels[r]]||_2 -> (1, 1) partial."""
    # Cast in-kernel: native dtype travels HBM->VMEM (no wrapper f32 copy).
    x = x_ref[...].astype(jnp.float32)            # (tb, D)
    labels = labels_ref[...]                      # (tb, 1) int32
    tb = x.shape[0]
    C = num_classes

    if use_mxu_gather:
        # One-hot gather on the MXU. Exact: products are either 0 or the
        # stored center value, accumulation is f32; the tb*C*D MACs ride the
        # otherwise-idle MXU slot and hide under the x DMA.
        centers = centers_ref[...]
        class_ids = jax.lax.broadcasted_iota(jnp.int32, (tb, C), 1)
        onehot = (labels == class_ids).astype(centers.dtype)
        gathered = jnp.dot(onehot, centers, preferred_element_type=jnp.float32)
    else:
        # Tiny C (== 4): a handful of masked selects on the VPU.
        centers = centers_ref[...].astype(jnp.float32)
        gathered = jnp.zeros_like(x)
        for c in range(C):
            sel = (labels == c).astype(jnp.float32)          # (tb, 1)
            gathered = gathered + sel * centers[c:c + 1, :]  # (tb, D)

    diff = x - gathered
    row_sq = jnp.sum(diff * diff, axis=1, keepdims=True)      # (tb, 1)
    dist = jnp.sqrt(row_sq)                                    # EUP

    if needs_mask:  # zero the padded rows of the overhanging last tile
        i = pl.program_id(0)
        row_idx = i * block_rows + jax.lax.broadcasted_iota(jnp.int32, (tb, 1), 0)
        dist = jnp.where(row_idx < batch, dist, 0.0)

    partial_ref[...] = jnp.sum(dist, keepdims=True)            # (1, 1)


def _tpu_vmem_capacity_bytes():
    try:
        return int(pltpu.get_tpu_info().vmem_capacity_bytes)
    except Exception:
        return 64 << 20   # conservative fallback: v7x per-TensorCore VMEM


def rank_loss(x, labels, centers, centers_distances, *, alpha=0.5, theta=10.0):
    B, D = x.shape
    C, D2 = centers.shape
    assert D == D2, "feat_dim mismatch"
    if C < 4:
        # cd[:, 2] / cd[0, 3] in the reference need >= 4 classes.
        raise ValueError("RankLoss requires num_classes >= 4")
    # NOTE: labels outside [0, C) gather a zero center here (PyTorch's
    # index_select would raise instead).

    labels2d = labels.reshape(B, 1).astype(jnp.int32)

    # Gather strategy: MXU one-hot for any C > 4 (VALU budget per element is
    # too small for masked selects on v6e/v7x once C approaches ~8-16).
    use_mxu_gather = C > 4

    # Generation-aware sizing.
    vmem_cap = _tpu_vmem_capacity_bytes()
    big_vmem = vmem_cap >= (100 << 20)          # v5e / v6e: 128 MiB physical
    target_tile_bytes = (6 << 20) if big_vmem else (3 << 20)
    vmem_cap_limit = (64 << 20) if big_vmem else (56 << 20)

    # Batch tile sized by bytes (HBM-streaming bound on x), multiple of 8.
    bytes_per_row = D * x.dtype.itemsize + 4          # x row + label
    tb = target_tile_bytes // max(bytes_per_row, 1)
    if use_mxu_gather:
        tb = min(tb, max(8, (2 << 20) // (C * 4)))    # cap (tb, C) one-hot
    tb = max(8, (tb // 8) * 8)
    if tb >= B:
        tb = B                                        # one tile = full batch
    num_tiles = pl.cdiv(B, tb)
    needs_mask = (num_tiles * tb) != B

    est_vmem = (2 * tb * D * x.dtype.itemsize           # x double buffer
                + 2 * tb * 4                            # labels double buffer
                + 2 * C * D * centers.dtype.itemsize    # centers (pipelined 2x)
                + 3 * tb * D * 4                        # f32 x / gathered / diff
                + (tb * C * 4 if use_mxu_gather else 0)  # one-hot intermediate
                + (2 << 20))                            # outputs / slack
    vmem_limit = int(min(max(est_vmem, 16 << 20), vmem_cap_limit))

    kernel = functools.partial(
        _dist_partial_kernel, num_classes=C, batch=B, block_rows=tb,
        needs_mask=needs_mask, use_mxu_gather=use_mxu_gather)

    partials = pl.pallas_call(
        kernel,
        out_shape=jax.ShapeDtypeStruct((num_tiles, 1), jnp.float32),
        grid_spec=pltpu.PrefetchScalarGridSpec(
            num_scalar_prefetch=0,
            grid=(num_tiles,),
            in_specs=[
                pl.BlockSpec((tb, D), lambda i: (i, 0)),   # x (native dtype)
                pl.BlockSpec((tb, 1), lambda i: (i, 0)),   # labels
                pl.BlockSpec((C, D), lambda i: (0, 0)),    # centers (fetched once)
            ],
            out_specs=pl.BlockSpec((1, 1), lambda i: (i, 0)),  # per-tile partial
        ),
        compiler_params=pltpu.CompilerParams(
            dimension_semantics=("parallel",),   # independent tiles -> both TCs on v7x
            vmem_limit_bytes=vmem_limit),
    )(x, labels2d, centers)

    # Rank-loss term: O(C^2), batch-independent -> plain JAX in the wrapper.
    cd = centers_distances.astype(jnp.float32)
    a = cd[:C - 2, 2].reshape(C - 2, 1)                  # cd[i, 2]
    b = cd[:, 1].reshape(1, C - 1)                       # cd[j, 1]
    rk1 = jnp.sum(jnp.maximum(0.0, theta - (a - b)))
    rk2 = jnp.sum(jnp.maximum(0.0, 2.0 * theta - (cd[0, 3] - cd[:, 1])))

    center_loss = 0.5 * jnp.sum(partials) / B            # mean(0.5 * dist)
    return alpha * (center_loss + rk1 + rk2)


if __name__ == "__main__":
    key = jax.random.PRNGKey(0)
    kx, kc, kl = jax.random.split(key, 3)

    B, C, D = 8, 8, 32          # batch, num_classes, feat_dim
    alpha, theta = 0.5, 10.0

    x = jax.random.normal(kx, (B, D), jnp.float32)
    labels = jax.random.randint(kl, (B,), 0, C, jnp.int32)
    # Module __init__: centers = randn(C, D), centers_distances = zeros(C-1, C)
    centers = jax.random.normal(kc, (C, D), jnp.float32)
    centers_distances = jnp.zeros((C - 1, C), jnp.float32)

    out = rank_loss(x, labels, centers, centers_distances,
                    alpha=alpha, theta=theta)
    out = jax.block_until_ready(out)

    # --- pure-JAX reference (mirrors the PyTorch forward) ---
    gathered = centers[labels]
    dist = jnp.linalg.norm(x - gathered, axis=1)
    loss = jnp.mean(0.5 * dist)
    cd = centers_distances
    rk1 = 0.0
    for i in range(C - 2):
        for j in range(C - 1):
            rk1 += jnp.maximum(0.0, theta - (cd[i, 2] - cd[j, 1]))
    rk2 = 0.0
    for j in range(C - 1):
        rk2 += jnp.maximum(0.0, 2.0 * theta - (cd[0, 3] - cd[j, 1]))
    ref = alpha * (loss + rk1 + rk2)

    assert jnp.allclose(out, ref, rtol=1e-5, atol=1e-5), (float(out), float(ref))
    print("KERNEL_OK")
</pallas_src>

<mosaic_0001>
module attributes {stable_mosaic.version = 11 : i64} {
  func.func @_dist_partial_kernel(%arg0: i32, %arg1: memref<8x32xf32, #tpu.memory_space<vmem>>, %arg2: memref<8x1xi32, #tpu.memory_space<vmem>>, %arg3: memref<8x32xf32, #tpu.memory_space<vmem>>, %arg4: memref<1x1xf32, #tpu.memory_space<vmem>>) attributes {dimension_semantics = [#tpu.dimension_semantics<parallel>], iteration_bounds = array<i64: 1>, scalar_prefetch = 0 : i64, scratch_operands = 0 : i64, tpu.core_type = #tpu.core_type<tc>, window_params = [{transform_indices = @transform_0, window_bounds = array<i64: 8, 32>}, {transform_indices = @transform_1, window_bounds = array<i64: 8, 1>}, {pipeline_mode = #tpu.pipeline_mode<synchronous>, transform_indices = @transform_2, window_bounds = array<i64: 8, 32>}, {transform_indices = @transform_3, window_bounds = array<i64: 1, 1>}]} {
    %c0 = arith.constant 0 : index
    %c0_0 = arith.constant 0 : index
    %0 = vector.load %arg1[%c0, %c0_0] : memref<8x32xf32, #tpu.memory_space<vmem>>, vector<8x32xf32>
    %c0_1 = arith.constant 0 : index
    %c0_2 = arith.constant 0 : index
    %1 = vector.load %arg2[%c0_1, %c0_2] : memref<8x1xi32, #tpu.memory_space<vmem>>, vector<8x1xi32>
    %c0_3 = arith.constant 0 : index
    %c0_4 = arith.constant 0 : index
    %2 = vector.load %arg3[%c0_3, %c0_4] : memref<8x32xf32, #tpu.memory_space<vmem>>, vector<8x32xf32>
    %3 = tpu.iota {dimensions = array<i32: 1>} : vector<8x8xi32>
    %4 = vector.broadcast %1 : vector<8x1xi32> to vector<8x8xi32>
    %5 = arith.cmpi eq, %4, %3 : vector<8x8xi32>
    %6 = arith.extui %5 : vector<8x8xi1> to vector<8x8xi32>
    %7 = arith.sitofp %6 : vector<8x8xi32> to vector<8x8xf32>
    %cst = arith.constant dense<0.000000e+00> : vector<8x32xf32>
    %8 = tpu.matmul %7, %2, %cst {dimension_numbers = #tpu.dot_dimension_numbers<[1], [0], [0], [1], [0, 0, 1, 1], [], []>} : vector<8x8xf32>, vector<8x32xf32>, vector<8x32xf32> -> vector<8x32xf32>
    %9 = arith.subf %0, %8 : vector<8x32xf32>
    %10 = arith.mulf %9, %9 : vector<8x32xf32>
    %cst_5 = arith.constant dense<0.000000e+00> : vector<8xf32>
    %11 = vector.multi_reduction <add>, %10, %cst_5 [1] : vector<8x32xf32> to vector<8xf32>
    %12 = vector.shape_cast %11 : vector<8xf32> to vector<8x1xf32>
    %13 = math.sqrt %12 : vector<8x1xf32>
    %14 = vector.shape_cast %13 : vector<8x1xf32> to vector<1x8x1xf32>
    %cst_6 = arith.constant dense<0.000000e+00> : vector<1xf32>
    %15 = vector.multi_reduction <add>, %14, %cst_6 [1, 2] : vector<1x8x1xf32> to vector<1xf32>
    %16 = vector.shape_cast %15 : vector<1xf32> to vector<1x1x1xf32>
    %17 = vector.extract %16[0, 0, 0] : f32 from vector<1x1x1xf32>
    %18 = vector.broadcast %17 : f32 to vector<1x1xf32>
    %c0_7 = arith.constant 0 : index
    %c0_8 = arith.constant 0 : index
    %19 = vector.load %arg4[%c0_7, %c0_8] : memref<1x1xf32, #tpu.memory_space<vmem>>, vector<1x1xf32>
    tpu.vector_store %arg4[%c0_7, %c0_8], %18 {strides = array<i32>} : memref<1x1xf32, #tpu.memory_space<vmem>>, vector<1x1xf32>,
    return
  }
  func.func @transform_0(%arg0: i32) -> (i32, i32) {
    %c0_i32 = arith.constant 0 : i32
    %c0_i32_0 = arith.constant 0 : i32
    return %arg0, %c0_i32 : i32, i32
  }
  func.func @transform_1(%arg0: i32) -> (i32, i32) {
    %c0_i32 = arith.constant 0 : i32
    %c0_i32_0 = arith.constant 0 : i32
    return %arg0, %c0_i32 : i32, i32
  }
  func.func @transform_2(%arg0: i32) -> (i32, i32) {
    %c0_i32 = arith.constant 0 : i32
    %c0_i32_0 = arith.constant 0 : i32
    %c0_i32_1 = arith.constant 0 : i32
    return %c0_i32, %c0_i32_0 : i32, i32
  }
  func.func @transform_3(%arg0: i32) -> (i32, i32) {
    %c0_i32 = arith.constant 0 : i32
    %c0_i32_0 = arith.constant 0 : i32
    return %arg0, %c0_i32 : i32, i32
  }
}

</mosaic_0001>

<bundles_post_ra>
// kernel: tpu_custom_call.1
= control target key start
LH: loop header
LB: loop body
LE: loop exit
PB: predicated region body
PF: predicated region fallthrough
CT: control target
= control target key end

     0   :  { %8 = vsyncpa [#allocation3], 0  ;;  %s212_s0 = inlined_call_operand.vmem [shape: f32[8,32], index: 0, kind: input, shape index: {}]   ;;  %s213_s1 = inlined_call_operand.vmem [shape: s32[8,1], index: 1, kind: input, shape index: {}]   ;;  %s214_s2 = inlined_call_operand.hbm [shape: f32[8,32], index: 2, kind: input, shape index: {}]   ;;  %s215_s3 = inlined_call_operand.hbm [shape: f32[1,1], index: 3, kind: output, shape index: {}]  }
   0x1   :  { %9 = vsyncpa [#allocation4], 0  ;;  %s19_s14 = sshll.u32 %s214_s2, 4  ;;  %s176_s15 = smov [#allocation2]   ;;  %s20_s14 = int_to_ptr.hbm [resolvable:$true] %s19_s14 }
   0x2   :  { %s21_s16 = sshll.u32 %s176_s15, 4  ;;  %s22_s16 = int_to_ptr.vmem [resolvable:$true] %s21_s16 }
   0x3   :  { %24 = dma.hbm_to_vmem [thread:$0]  %s20_s14, 128, %s22_s16, [#allocation3]  }
   0x4   :  { %172 = dma.done.wait [#allocation3], 128  }
   0x5   :  { %173 = vsyncadd [#allocation3], 4294967168  ;;  %v177_v0 = vmov 0   ;;  %v30_v1 = vld [vmem:[%s213_s1] sm:$0xff]  ;;  %v32_v3 = vlaneseq  ;;  %vm40_vm0 = vcmask 64512   ;;  %v178_v6 = vmov 0.0  }
   0x6   :  { %121 = vset.pattern.permute.xlu0 %v177_v0  ;;  %v31_v2 = vld [vmem:[#allocation2] sm:$0xff]  ;;  %vm66_vm2 = vcmask 261120   ;;  %vm82_vm4 = vcmask 7168   ;;  %s103_s22 = sshll.u32 %s215_s3, 4  ;;  %vm94_vm6 = vcmask 0   ;;  %s104_s22 = int_to_ptr.hbm [resolvable:$true] %s103_s22 }
   0x7   :  { %35 = vperm.xlu0 %121, %v30_v1   ;;  %59 = vmatpush.msra.mxu0 %v31_v2  ;;  %v33_v4 = vand.u32 127, %v32_v3  ;;  %v29_v8 = vld [vmem:[%s212_s0] sm:$0xff]  ;;  %s179_s0 = smov [#allocation5]  }
   0x8   :  { %s101_s1 = sshll.u32 %s179_s0, 4  ;;  %s102_s1 = int_to_ptr.vmem [resolvable:$true] %s101_s1 }
  0x79   :  { %v36_v5 = vpop.permute.xlu0 %35 }
  0x7a   :  { %vm37_vm1 = vcmp.eq.s32.totalorder %v36_v5, %v33_v4 }
  0x7b   :  { %v113_v7 = vsel %vm37_vm1, 1.0, %v178_v6 }
  0x7c   :  { %114 = vmatmul.msk.f32.vlgmr.msra.gmra.mxu0 %vm40_vm0, %v113_v7 }
  0xf9   :  { %v61_v9 = vpop.f32.mrf.mxu0 }
  0xfa   :  { %v64_v10 = vsub.f32 %v29_v8, %v61_v9 }
  0xfc   :  { %v65_v11 = vmul.f32 %v64_v10, %v64_v10 }
  0xfe   :  { %v67_v12 = vsel %vm66_vm2, %v65_v11, 0.0 }
  0xff   :  { %68 = vadd.xlane.f32.xlu0 %v67_v12 }
 0x172   :  { %v69_v13 = vpop.xlane.xlu0 %68 }
 0x173   :  { %122 = vrsqrt.f32 %v69_v13  ;;  %vm77_vm3 = vcmp.eq.f32.partialorder %v69_v13, inf  ;;  %v80_v21 = vand.u32 2147483648, %v69_v13  ;;  %vm79_vm5 = vcmp.eq.f32.partialorder %v69_v13, 0.0 }
 0x179   :  { %v123_v14 = vpop.eup %122 }
 0x17a   :  { %v71_v15 = vmul.f32 %v123_v14, %v69_v13 }
 0x17c   :  { %v72_v16 = vmul.f32 %v123_v14, %v71_v15 }
 0x17e   :  { %v73_v17 = vmul.f32 0.5, %v72_v16 }
 0x180   :  { %v74_v18 = vsub.f32 1.5, %v73_v17 }
 0x182   :  { %v75_v19 = vmul.f32 %v123_v14, %v74_v18 }
 0x184   :  { %v76_v20 = vmul.f32 %v75_v19, %v69_v13 }
 0x186   :  { %v78_v22 = vsel %vm77_vm3, %v69_v13, %v76_v20 }
 0x187   :  { %v81_v23 = vsel %vm79_vm5, %v80_v21, %v78_v22 }
 0x188   :  { %v83_v24 = vsel %vm82_vm4, %v81_v23, 0.0 }
 0x189   :  { %84 = vadd.xlane.f32.xlu1 %v83_v24 }
 0x1fc   :  { %v85_v25 = vpop.xlane.xlu1 %84 }
 0x1fd   :  { %v86_v26 = vrot.slane %v85_v25, 4 }
 0x1ff   :  { %v87_v27 = vadd.f32 %v86_v26, %v85_v25 }
 0x201   :  { %v88_v28 = vrot.slane %v87_v27, 2 }
 0x203   :  { %v89_v29 = vadd.f32 %v88_v28, %v87_v27 }
 0x205   :  { %v90_v30 = vrot.slane %v89_v29, 1 }
 0x207   :  { %v91_v31 = vadd.f32 %v90_v30, %v89_v29 }
 0x209   :  { %115 = vpush %v91_v31 }
 0x23a   :  { %s116_s23 = spop %115 }
 0x23b   :  { %v93_v32 = vstv %s116_s23 }
 0x23c   :  { %95 = vst.msk [vmem:[#allocation5] sm:$0x1] %vm94_vm6, %v93_v32 }
 0x23d   :  { %106 = dma.vmem_to_hbm [thread:$0]  %s102_s1, 16, %s104_s22, [#allocation4]  }
 0x23e   :  { %174 = dma.done.wait [#allocation4], 16  }
 0x23f   :  { %175 = vsyncadd [#allocation4], 4294967280 }
 0x240   :  { %111 = vsyncpa [#allocation3], 1 }
 0x241   :  { %112 = vsyncpa [#allocation4], 1 }

</bundles_post_ra>
